<compile_context>
chip_gen: v7x
topology: tpu7x:2x2x1
jax: 0.10.0
libtpu: 0.0.40
codegen_flags: <defaults>
</compile_context>

<pallas_src>
import math

import jax
import jax.numpy as jnp
from jax.experimental import pallas as pl
from jax.experimental.pallas import tpu as pltpu

# ---------------- configuration (small shapes consistent with the module) ---
B = 2            # batch
N = 4            # agents
BN = B * N
T_OBS = 8        # observed timesteps
INPUT_DIM = 2
HIDDEN = 32      # LSTM hidden dim
GCN_DIM = 32
HEADS = 4
DHEAD = GCN_DIM // HEADS
DEGREE = 3
K_CTRL = DEGREE + 1
FUT = 10         # future_len
OUT_PAD = 128    # decoder output padded to a full 128-lane store
DIST_THRESH = 10.0   # assumed adjacency distance threshold

# lane offsets inside the fused weight slab (all pieces have 32 sublane rows)
_W_WHH = 0                        # [32, 128]  recurrent LSTM weight (gate-permuted)
_W_COMB = _W_WHH + 4 * HIDDEN     # [32, 128]  Wo folded with Bezier decode (padded)
_W_QKV = _W_COMB + OUT_PAD        # [32,  96]  fused Q/K/V projection
_W_GCN = _W_QKV + 3 * GCN_DIM     # [32,  32]  GCN linear
_W_HMASK = _W_GCN + GCN_DIM       # [32,  32]  head lane mask (heads on sublanes)
_W_AMASK = _W_HMASK + GCN_DIM     # [32,   8]  additive cross-batch attention mask
_W_TOTAL = _W_AMASK + BN          # 424

# lane offsets inside the bias slab
_B_GCN = 0                        # [1, 32]
_B_QKV = _B_GCN + GCN_DIM         # [1, 96]
_B_COMB = _B_QKV + 3 * GCN_DIM    # [1, 128]
_B_TOTAL = _B_COMB + OUT_PAD      # 256


# ============================ fused kernel ===================================
def fused_kernel(gates_ref, adj_ref, wslab_ref, bslab_ref, out_ref):
    """All stages fused; everything stays in vregs/VMEM.

    gates_ref : [T, BN, 4H]  precomputed x_t @ W_ih^T + (b_ih + b_hh), gate order [i|f|o|g]
    adj_ref   : [BN, BN]     block-diagonal row-normalized adjacency (from positions)
    wslab_ref : [32, 424]    [whh | w_comb | w_qkv | w_gcn | hmask | amask]
    bslab_ref : [1, 256]     [b_gcn | b_qkv | b_comb]
    out_ref   : [BN, 128]    cols 0:FUT = x traj, FUT:2FUT = y traj, rest zero-pad
    """
    H = HIDDEN
    G = GCN_DIM

    # one-time static slices of the weight slab (hoisted, outside all loops)
    whh = wslab_ref[:, _W_WHH:_W_WHH + 4 * H]            # [H, 4H]
    w_comb = wslab_ref[:, _W_COMB:_W_COMB + OUT_PAD]     # [G, 128]
    w_qkv = wslab_ref[:, _W_QKV:_W_QKV + 3 * G]          # [G, 3G]
    w_gcn = wslab_ref[:, _W_GCN:_W_GCN + G]              # [H, G]
    hmask = wslab_ref[:, _W_HMASK:_W_HMASK + G]          # [HEADS*BN, G]
    amask = wslab_ref[:, _W_AMASK:_W_AMASK + BN]         # [HEADS*BN, BN]
    b_gcn = bslab_ref[:, _B_GCN:_B_GCN + G]              # [1, G]
    b_qkv = bslab_ref[:, _B_QKV:_B_QKV + 3 * G]          # [1, 3G]
    b_comb = bslab_ref[:, _B_COMB:_B_COMB + OUT_PAD]     # [1, 128]

    # ---- 1. LSTM recurrence (input projection hoisted; gates = [i|f|o|g]) ---
    def step(t, carry):
        h, c = carry
        gates = gates_ref[t] + jnp.dot(h, whh, preferred_element_type=jnp.float32)
        sig = jax.nn.sigmoid(gates[:, 0:3 * H])          # one EUP pass for i,f,o
        i_g = sig[:, 0:H]
        f_g = sig[:, H:2 * H]
        o_g = sig[:, 2 * H:3 * H]
        g_g = jnp.tanh(gates[:, 3 * H:4 * H])
        c = f_g * c + i_g * g_g
        h = o_g * jnp.tanh(c)
        return (h, c)

    h0 = jnp.zeros((BN, H), jnp.float32)
    c0 = jnp.zeros((BN, H), jnp.float32)
    h, _ = jax.lax.fori_loop(0, T_OBS, step, (h0, c0), unroll=True)   # [BN, H]

    # ---- 2. GCN interaction: block-diagonal adjacency precomputed in wrapper
    agg = jnp.dot(adj_ref[...], h, preferred_element_type=jnp.float32)      # [BN, H]
    gcn = jnp.maximum(
        jnp.dot(agg, w_gcn, preferred_element_type=jnp.float32) + b_gcn, 0.0)  # [BN, G]

    # ---- 3. MHSA over all BN rows, heads stacked on sublanes ----------------
    qkv = jnp.dot(gcn, w_qkv, preferred_element_type=jnp.float32) + b_qkv   # [BN, 3G]
    q = qkv[:, 0:G]
    k = qkv[:, G:2 * G]
    v = qkv[:, 2 * G:3 * G]

    # Q stacked per head on sublanes, masked to its head's lanes -> one score matmul
    q_stack = jnp.concatenate([q] * HEADS, axis=0) * hmask                  # [H*BN, G]
    s = jax.lax.dot_general(q_stack, k, (((1,), (1,)), ((), ())),
                            preferred_element_type=jnp.float32)             # [H*BN, BN]
    s = s * (1.0 / math.sqrt(DHEAD)) + amask            # kill cross-batch entries

    # ONE softmax pass over all (batch, head, query) rows
    m = jnp.max(s, axis=-1, keepdims=True)
    p = jnp.exp(s - m)
    denom = jnp.sum(p, axis=-1, keepdims=True)
    p = p * pl.reciprocal(denom, approx=True)                               # [H*BN, BN]

    # p @ V per head: sublane-sliced P (aligned), lane-masked accumulation
    attn = None
    for hh in range(HEADS):
        lo = hh * BN
        part = jnp.dot(p[lo:lo + BN, :], v,
                       preferred_element_type=jnp.float32) * hmask[lo:lo + BN, :]
        attn = part if attn is None else attn + part                        # [BN, G]

    # ---- 4. out-proj + Bezier decode folded into one padded, lane-dense matmul
    out_ref[...] = (jnp.dot(attn, w_comb, preferred_element_type=jnp.float32)
                    + b_comb)


# ============================ params / helpers ===============================
def bernstein_basis(degree, t_len):
    t = jnp.linspace(0.0, 1.0, t_len)
    cols = []
    for kk in range(degree + 1):
        c = float(math.comb(degree, kk))
        cols.append(c * (t ** kk) * ((1.0 - t) ** (degree - kk)))
    return jnp.stack(cols, axis=-1).astype(jnp.float32)   # [t_len, degree+1]


def init_params(key):
    ks = jax.random.split(key, 14)
    s = 0.1
    p = {}
    # LSTM (PyTorch shapes: weight_ih [4H, in], weight_hh [4H, H], biases [4H])
    p["w_ih"] = s * jax.random.normal(ks[0], (4 * HIDDEN, INPUT_DIM), jnp.float32)
    p["w_hh"] = s * jax.random.normal(ks[1], (4 * HIDDEN, HIDDEN), jnp.float32)
    p["b_ih"] = s * jax.random.normal(ks[2], (4 * HIDDEN,), jnp.float32)
    p["b_hh"] = s * jax.random.normal(ks[3], (4 * HIDDEN,), jnp.float32)
    # GCN linear (right-multiply form [H, G])
    p["w_gcn"] = s * jax.random.normal(ks[4], (HIDDEN, GCN_DIM), jnp.float32)
    p["b_gcn"] = s * jax.random.normal(ks[5], (GCN_DIM,), jnp.float32)
    # MHSA projections [D, D]
    p["wq"] = s * jax.random.normal(ks[6], (GCN_DIM, GCN_DIM), jnp.float32)
    p["wk"] = s * jax.random.normal(ks[7], (GCN_DIM, GCN_DIM), jnp.float32)
    p["wv"] = s * jax.random.normal(ks[8], (GCN_DIM, GCN_DIM), jnp.float32)
    p["wo"] = s * jax.random.normal(ks[9], (GCN_DIM, GCN_DIM), jnp.float32)
    p["bq"] = s * jax.random.normal(ks[10], (GCN_DIM,), jnp.float32)
    p["bk"] = s * jax.random.normal(ks[11], (GCN_DIM,), jnp.float32)
    p["bv"] = jnp.zeros((GCN_DIM,), jnp.float32)
    p["bo"] = jnp.zeros((GCN_DIM,), jnp.float32)
    # Bezier decoder: D -> (degree+1)*2 control-point coords (PyTorch col order)
    p["w_dec"] = s * jax.random.normal(ks[12], (GCN_DIM, K_CTRL * 2), jnp.float32)
    p["b_dec"] = s * jax.random.normal(ks[13], (K_CTRL * 2,), jnp.float32)
    return p


def prepare_params(params):
    """One-time weight re-layout / fusion done outside the kernel."""
    H = HIDDEN
    G = GCN_DIM
    prep = {}

    # --- LSTM: reorder gate blocks [i|f|g|o] (PyTorch) -> [i|f|o|g] ----------
    perm = jnp.concatenate([jnp.arange(0, 2 * H),
                            jnp.arange(3 * H, 4 * H),
                            jnp.arange(2 * H, 3 * H)])
    w_ih_p = params["w_ih"][perm]                               # [4H, in]
    w_hh_p = params["w_hh"][perm]                               # [4H, H]
    bias_p = (params["b_ih"] + params["b_hh"])[perm]            # [4H]
    prep["w_ih_t"] = w_ih_p.T                                   # [in, 4H]
    prep["lstm_bias"] = bias_p[None, :]                         # [1, 4H]
    whh_t = w_hh_p.T                                            # [H, 4H]

    # --- Bezier decoder folded with Bernstein basis AND the MHSA out-proj ----
    # TODO(synk): assumes the decoder Linear output is interleaved as (k, coord)
    # -> column 2k+d; verify against the real BezierDecoder if available.
    K = K_CTRL
    cols = jnp.array([2 * kk for kk in range(K)] + [2 * kk + 1 for kk in range(K)])
    w_dec_r = params["w_dec"][:, cols]                          # [G, 2K]
    b_dec_r = params["b_dec"][cols]                             # [2K]
    basisT = bernstein_basis(DEGREE, FUT).T                     # [K, FUT]
    zeros = jnp.zeros((K, FUT), jnp.float32)
    basis2 = jnp.concatenate(
        [jnp.concatenate([basisT, zeros], axis=1),
         jnp.concatenate([zeros, basisT], axis=1)], axis=0)     # [2K, 2FUT]
    w_traj = w_dec_r @ basis2                                   # [G, 2FUT]
    b_traj = b_dec_r @ basis2                                   # [2FUT]
    # fold MHSA output projection (linear, no nonlinearity in between)
    w_comb = params["wo"] @ w_traj                              # [G, 2FUT]
    b_comb = params["bo"] @ w_traj + b_traj                     # [2FUT]
    w_comb = jnp.pad(w_comb, ((0, 0), (0, OUT_PAD - 2 * FUT)))  # [G, 128]
    b_comb = jnp.pad(b_comb, (0, OUT_PAD - 2 * FUT))            # [128]

    # --- fused QKV projection -------------------------------------------------
    w_qkv = jnp.concatenate([params["wq"], params["wk"], params["wv"]], axis=1)
    b_qkv = jnp.concatenate([params["bq"], params["bk"], params["bv"]])

    # --- attention constant masks (heads stacked on sublanes) -----------------
    rows = jnp.arange(HEADS * BN)                               # h*BN + i
    row_head = rows // BN
    row_batch = (rows % BN) // N
    g_head = jnp.arange(G) // DHEAD
    hmask = (g_head[None, :] == row_head[:, None]).astype(jnp.float32)       # [H*BN, G]
    col_batch = jnp.arange(BN) // N
    amask = jnp.where(row_batch[:, None] == col_batch[None, :], 0.0, -1e9)   # [H*BN, BN]
    amask = amask.astype(jnp.float32)

    # --- single weight slab + single bias slab (12 inputs -> 4) ---------------
    w_slab = jnp.concatenate(
        [whh_t, w_comb, w_qkv, params["w_gcn"], hmask, amask], axis=1)        # [32, 424]
    b_slab = jnp.concatenate(
        [params["b_gcn"], b_qkv, b_comb])[None, :]                            # [1, 256]
    assert w_slab.shape == (HIDDEN, _W_TOTAL)
    assert b_slab.shape == (1, _B_TOTAL)
    prep["w_slab"] = w_slab.astype(jnp.float32)
    prep["b_slab"] = b_slab.astype(jnp.float32)
    return prep


# ============================ wrapper ========================================
def trajectory_predictor(hist, pos, prep):
    # Hoisted LSTM input projection (cheap XLA op, off the serial chain):
    # [T, BN, INPUT_DIM] @ [INPUT_DIM, 4H] -> lane-dense [T, BN, 4H].
    x_tm = jnp.transpose(hist.reshape(BN, T_OBS, INPUT_DIM), (1, 0, 2))
    gates_in = jnp.matmul(x_tm, prep["w_ih_t"]) + prep["lstm_bias"]

    # Block-diagonal row-normalized adjacency (depends only on positions).
    # TODO(synk): thresholded (d^2 < thresh^2, self-loops kept) + row norm by
    # max(deg, 1) assumed for build_adjacency_matrix.
    diff = pos[:, :, None, :] - pos[:, None, :, :]                   # [B, N, N, 2]
    d2 = jnp.sum(diff * diff, axis=-1)
    adj = (d2 < DIST_THRESH * DIST_THRESH).astype(jnp.float32)
    adj = adj / jnp.maximum(jnp.sum(adj, axis=-1, keepdims=True), 1.0)
    adj_bd = jnp.zeros((BN, BN), jnp.float32)
    for b in range(B):
        adj_bd = jax.lax.dynamic_update_slice(adj_bd, adj[b], (b * N, b * N))

    out = pl.pallas_call(
        fused_kernel,
        out_shape=jax.ShapeDtypeStruct((BN, OUT_PAD), jnp.float32),
        grid=(1,),
        in_specs=[
            pl.BlockSpec((T_OBS, BN, 4 * HIDDEN), lambda i: (0, 0, 0)),
            pl.BlockSpec((BN, BN), lambda i: (0, 0)),
            pl.BlockSpec((HIDDEN, _W_TOTAL), lambda i: (0, 0)),
            pl.BlockSpec((1, _B_TOTAL), lambda i: (0, 0)),
        ],
        out_specs=pl.BlockSpec((BN, OUT_PAD), lambda i: (0, 0)),
        compiler_params=pltpu.CompilerParams(dimension_semantics=("arbitrary",)),
    )(gates_in, adj_bd, prep["w_slab"], prep["b_slab"])

    # [BN, 128] -> slice valid 2*FUT lanes -> [B, N, FUT, 2]
    traj = out[:, :2 * FUT]
    return jnp.transpose(traj.reshape(B, N, 2, FUT), (0, 1, 3, 2))


# ============================ main ===========================================
if __name__ == "__main__":
    key = jax.random.PRNGKey(0)
    k_hist, k_pos, k_params = jax.random.split(key, 3)
    agent_histories = jax.random.normal(k_hist, (B, N, T_OBS, INPUT_DIM), jnp.float32)
    agent_positions = 5.0 * jax.random.normal(k_pos, (B, N, 2), jnp.float32)
    params = init_params(k_params)
    prep = prepare_params(params)

    @jax.jit
    def predict(hist, pos):
        return trajectory_predictor(hist, pos, prep)     # [B, N, FUT, 2]

    traj = predict(agent_histories, agent_positions)
    jax.block_until_ready(traj)
    assert traj.shape == (B, N, FUT, 2), traj.shape
    assert bool(jnp.all(jnp.isfinite(traj)))
    print("KERNEL_OK")
</pallas_src>

<mosaic_0001>
module attributes {stable_mosaic.version = 11 : i64} {
  func.func @fused_kernel(%arg0: i32, %arg1: memref<8x8x128xf32, #tpu.memory_space<vmem>>, %arg2: memref<8x8xf32, #tpu.memory_space<vmem>>, %arg3: memref<32x424xf32, #tpu.memory_space<vmem>>, %arg4: memref<1x256xf32, #tpu.memory_space<vmem>>, %arg5: memref<8x128xf32, #tpu.memory_space<vmem>>) attributes {dimension_semantics = [#tpu.dimension_semantics<arbitrary>], iteration_bounds = array<i64: 1>, scalar_prefetch = 0 : i64, scratch_operands = 0 : i64, tpu.core_type = #tpu.core_type<tc>, window_params = [{pipeline_mode = #tpu.pipeline_mode<synchronous>, transform_indices = @transform_0, window_bounds = array<i64: 8, 8, 128>}, {pipeline_mode = #tpu.pipeline_mode<synchronous>, transform_indices = @transform_1, window_bounds = array<i64: 8, 8>}, {pipeline_mode = #tpu.pipeline_mode<synchronous>, transform_indices = @transform_2, window_bounds = array<i64: 32, 424>}, {pipeline_mode = #tpu.pipeline_mode<synchronous>, transform_indices = @transform_3, window_bounds = array<i64: 1, 256>}, {pipeline_mode = #tpu.pipeline_mode<synchronous>, transform_indices = @transform_4, window_bounds = array<i64: 8, 128>}]} {
    %c0 = arith.constant 0 : index
    %c0_0 = arith.constant 0 : index
    %0 = vector.load %arg3[%c0, %c0_0] : memref<32x424xf32, #tpu.memory_space<vmem>>, vector<32x128xf32>
    %c0_1 = arith.constant 0 : index
    %c128 = arith.constant 128 : index
    %1 = vector.load %arg3[%c0_1, %c128] : memref<32x424xf32, #tpu.memory_space<vmem>>, vector<32x128xf32>
    %c0_2 = arith.constant 0 : index
    %c256 = arith.constant 256 : index
    %2 = vector.load %arg3[%c0_2, %c256] : memref<32x424xf32, #tpu.memory_space<vmem>>, vector<32x96xf32>
    %c0_3 = arith.constant 0 : index
    %c352 = arith.constant 352 : index
    %3 = vector.load %arg3[%c0_3, %c352] : memref<32x424xf32, #tpu.memory_space<vmem>>, vector<32x32xf32>
    %c0_4 = arith.constant 0 : index
    %c384 = arith.constant 384 : index
    %4 = vector.load %arg3[%c0_4, %c384] : memref<32x424xf32, #tpu.memory_space<vmem>>, vector<32x32xf32>
    %c0_5 = arith.constant 0 : index
    %c416 = arith.constant 416 : index
    %5 = vector.load %arg3[%c0_5, %c416] : memref<32x424xf32, #tpu.memory_space<vmem>>, vector<32x8xf32>
    %c0_6 = arith.constant 0 : index
    %c0_7 = arith.constant 0 : index
    %6 = vector.load %arg4[%c0_6, %c0_7] : memref<1x256xf32, #tpu.memory_space<vmem>>, vector<1x32xf32>
    %c0_8 = arith.constant 0 : index
    %c32 = arith.constant 32 : index
    %7 = vector.load %arg4[%c0_8, %c32] : memref<1x256xf32, #tpu.memory_space<vmem>>, vector<1x96xf32>
    %c0_9 = arith.constant 0 : index
    %c128_10 = arith.constant 128 : index
    %8 = vector.load %arg4[%c0_9, %c128_10] : memref<1x256xf32, #tpu.memory_space<vmem>>, vector<1x128xf32>
    %cst = arith.constant 0.000000e+00 : f32
    %9 = vector.broadcast %cst : f32 to vector<8x32xf32>
    %cst_11 = arith.constant 0.000000e+00 : f32
    %10 = vector.broadcast %cst_11 : f32 to vector<8x32xf32>
    %c0_i32 = arith.constant 0 : i32
    %11 = arith.index_cast %c0_i32 : i32 to index
    %c0_12 = arith.constant 0 : index
    %c0_13 = arith.constant 0 : index
    %12 = vector.load %arg1[%11, %c0_12, %c0_13] : memref<8x8x128xf32, #tpu.memory_space<vmem>>, vector<1x8x128xf32>
    %13 = vector.shape_cast %12 : vector<1x8x128xf32> to vector<8x128xf32>
    %cst_14 = arith.constant dense<0.000000e+00> : vector<8x128xf32>
    %14 = tpu.matmul %9, %0, %cst_14 {dimension_numbers = #tpu.dot_dimension_numbers<[1], [0], [0], [1], [0, 0, 1, 1], [], []>} : vector<8x32xf32>, vector<32x128xf32>, vector<8x128xf32> -> vector<8x128xf32>
    %15 = arith.addf %13, %14 : vector<8x128xf32>
    %16 = vector.extract_strided_slice %15 {offsets = [0, 0], sizes = [8, 96], strides = [1, 1]} : vector<8x128xf32> to vector<8x96xf32>
    %17 = arith.negf %16 : vector<8x96xf32>
    %18 = math.exp %17 : vector<8x96xf32>
    %cst_15 = arith.constant 1.000000e+00 : f32
    %19 = vector.broadcast %cst_15 : f32 to vector<8x96xf32>
    %20 = arith.addf %19, %18 : vector<8x96xf32>
    %21 = arith.divf %19, %20 : vector<8x96xf32>
    %22 = vector.extract_strided_slice %21 {offsets = [0, 0], sizes = [8, 32], strides = [1, 1]} : vector<8x96xf32> to vector<8x32xf32>
    %23 = vector.extract_strided_slice %21 {offsets = [0, 32], sizes = [8, 32], strides = [1, 1]} : vector<8x96xf32> to vector<8x32xf32>
    %24 = vector.extract_strided_slice %21 {offsets = [0, 64], sizes = [8, 32], strides = [1, 1]} : vector<8x96xf32> to vector<8x32xf32>
    %25 = vector.extract_strided_slice %15 {offsets = [0, 96], sizes = [8, 32], strides = [1, 1]} : vector<8x128xf32> to vector<8x32xf32>
    %26 = math.tanh %25 : vector<8x32xf32>
    %27 = arith.mulf %23, %10 : vector<8x32xf32>
    %28 = arith.mulf %22, %26 : vector<8x32xf32>
    %29 = arith.addf %27, %28 : vector<8x32xf32>
    %30 = math.tanh %29 : vector<8x32xf32>
    %31 = arith.mulf %24, %30 : vector<8x32xf32>
    %c1_i32 = arith.constant 1 : i32
    %32 = arith.index_cast %c1_i32 : i32 to index
    %c0_16 = arith.constant 0 : index
    %c0_17 = arith.constant 0 : index
    %33 = vector.load %arg1[%32, %c0_16, %c0_17] : memref<8x8x128xf32, #tpu.memory_space<vmem>>, vector<1x8x128xf32>
    %34 = vector.shape_cast %33 : vector<1x8x128xf32> to vector<8x128xf32>
    %cst_18 = arith.constant dense<0.000000e+00> : vector<8x128xf32>
    %35 = tpu.matmul %31, %0, %cst_18 {dimension_numbers = #tpu.dot_dimension_numbers<[1], [0], [0], [1], [0, 0, 1, 1], [], []>} : vector<8x32xf32>, vector<32x128xf32>, vector<8x128xf32> -> vector<8x128xf32>
    %36 = arith.addf %34, %35 : vector<8x128xf32>
    %37 = vector.extract_strided_slice %36 {offsets = [0, 0], sizes = [8, 96], strides = [1, 1]} : vector<8x128xf32> to vector<8x96xf32>
    %38 = arith.negf %37 : vector<8x96xf32>
    %39 = math.exp %38 : vector<8x96xf32>
    %cst_19 = arith.constant 1.000000e+00 : f32
    %40 = vector.broadcast %cst_19 : f32 to vector<8x96xf32>
    %41 = arith.addf %40, %39 : vector<8x96xf32>
    %42 = arith.divf %40, %41 : vector<8x96xf32>
    %43 = vector.extract_strided_slice %42 {offsets = [0, 0], sizes = [8, 32], strides = [1, 1]} : vector<8x96xf32> to vector<8x32xf32>
    %44 = vector.extract_strided_slice %42 {offsets = [0, 32], sizes = [8, 32], strides = [1, 1]} : vector<8x96xf32> to vector<8x32xf32>
    %45 = vector.extract_strided_slice %42 {offsets = [0, 64], sizes = [8, 32], strides = [1, 1]} : vector<8x96xf32> to vector<8x32xf32>
    %46 = vector.extract_strided_slice %36 {offsets = [0, 96], sizes = [8, 32], strides = [1, 1]} : vector<8x128xf32> to vector<8x32xf32>
    %47 = math.tanh %46 : vector<8x32xf32>
    %48 = arith.mulf %44, %29 : vector<8x32xf32>
    %49 = arith.mulf %43, %47 : vector<8x32xf32>
    %50 = arith.addf %48, %49 : vector<8x32xf32>
    %51 = math.tanh %50 : vector<8x32xf32>
    %52 = arith.mulf %45, %51 : vector<8x32xf32>
    %c2_i32 = arith.constant 2 : i32
    %53 = arith.index_cast %c2_i32 : i32 to index
    %c0_20 = arith.constant 0 : index
    %c0_21 = arith.constant 0 : index
    %54 = vector.load %arg1[%53, %c0_20, %c0_21] : memref<8x8x128xf32, #tpu.memory_space<vmem>>, vector<1x8x128xf32>
    %55 = vector.shape_cast %54 : vector<1x8x128xf32> to vector<8x128xf32>
    %cst_22 = arith.constant dense<0.000000e+00> : vector<8x128xf32>
    %56 = tpu.matmul %52, %0, %cst_22 {dimension_numbers = #tpu.dot_dimension_numbers<[1], [0], [0], [1], [0, 0, 1, 1], [], []>} : vector<8x32xf32>, vector<32x128xf32>, vector<8x128xf32> -> vector<8x128xf32>
    %57 = arith.addf %55, %56 : vector<8x128xf32>
    %58 = vector.extract_strided_slice %57 {offsets = [0, 0], sizes = [8, 96], strides = [1, 1]} : vector<8x128xf32> to vector<8x96xf32>
    %59 = arith.negf %58 : vector<8x96xf32>
    %60 = math.exp %59 : vector<8x96xf32>
    %cst_23 = arith.constant 1.000000e+00 : f32
    %61 = vector.broadcast %cst_23 : f32 to vector<8x96xf32>
    %62 = arith.addf %61, %60 : vector<8x96xf32>
    %63 = arith.divf %61, %62 : vector<8x96xf32>
    %64 = vector.extract_strided_slice %63 {offsets = [0, 0], sizes = [8, 32], strides = [1, 1]} : vector<8x96xf32> to vector<8x32xf32>
    %65 = vector.extract_strided_slice %63 {offsets = [0, 32], sizes = [8, 32], strides = [1, 1]} : vector<8x96xf32> to vector<8x32xf32>
    %66 = vector.extract_strided_slice %63 {offsets = [0, 64], sizes = [8, 32], strides = [1, 1]} : vector<8x96xf32> to vector<8x32xf32>
    %67 = vector.extract_strided_slice %57 {offsets = [0, 96], sizes = [8, 32], strides = [1, 1]} : vector<8x128xf32> to vector<8x32xf32>
    %68 = math.tanh %67 : vector<8x32xf32>
    %69 = arith.mulf %65, %50 : vector<8x32xf32>
    %70 = arith.mulf %64, %68 : vector<8x32xf32>
    %71 = arith.addf %69, %70 : vector<8x32xf32>
    %72 = math.tanh %71 : vector<8x32xf32>
    %73 = arith.mulf %66, %72 : vector<8x32xf32>
    %c3_i32 = arith.constant 3 : i32
    %74 = arith.index_cast %c3_i32 : i32 to index
    %c0_24 = arith.constant 0 : index
    %c0_25 = arith.constant 0 : index
    %75 = vector.load %arg1[%74, %c0_24, %c0_25] : memref<8x8x128xf32, #tpu.memory_space<vmem>>, vector<1x8x128xf32>
    %76 = vector.shape_cast %75 : vector<1x8x128xf32> to vector<8x128xf32>
    %cst_26 = arith.constant dense<0.000000e+00> : vector<8x128xf32>
    %77 = tpu.matmul %73, %0, %cst_26 {dimension_numbers = #tpu.dot_dimension_numbers<[1], [0], [0], [1], [0, 0, 1, 1], [], []>} : vector<8x32xf32>, vector<32x128xf32>, vector<8x128xf32> -> vector<8x128xf32>
    %78 = arith.addf %76, %77 : vector<8x128xf32>
    %79 = vector.extract_strided_slice %78 {offsets = [0, 0], sizes = [8, 96], strides = [1, 1]} : vector<8x128xf32> to vector<8x96xf32>
    %80 = arith.negf %79 : vector<8x96xf32>
    %81 = math.exp %80 : vector<8x96xf32>
    %cst_27 = arith.constant 1.000000e+00 : f32
    %82 = vector.broadcast %cst_27 : f32 to vector<8x96xf32>
    %83 = arith.addf %82, %81 : vector<8x96xf32>
    %84 = arith.divf %82, %83 : vector<8x96xf32>
    %85 = vector.extract_strided_slice %84 {offsets = [0, 0], sizes = [8, 32], strides = [1, 1]} : vector<8x96xf32> to vector<8x32xf32>
    %86 = vector.extract_strided_slice %84 {offsets = [0, 32], sizes = [8, 32], strides = [1, 1]} : vector<8x96xf32> to vector<8x32xf32>
    %87 = vector.extract_strided_slice %84 {offsets = [0, 64], sizes = [8, 32], strides = [1, 1]} : vector<8x96xf32> to vector<8x32xf32>
    %88 = vector.extract_strided_slice %78 {offsets = [0, 96], sizes = [8, 32], strides = [1, 1]} : vector<8x128xf32> to vector<8x32xf32>
    %89 = math.tanh %88 : vector<8x32xf32>
    %90 = arith.mulf %86, %71 : vector<8x32xf32>
    %91 = arith.mulf %85, %89 : vector<8x32xf32>
    %92 = arith.addf %90, %91 : vector<8x32xf32>
    %93 = math.tanh %92 : vector<8x32xf32>
    %94 = arith.mulf %87, %93 : vector<8x32xf32>
    %c4_i32 = arith.constant 4 : i32
    %95 = arith.index_cast %c4_i32 : i32 to index
    %c0_28 = arith.constant 0 : index
    %c0_29 = arith.constant 0 : index
    %96 = vector.load %arg1[%95, %c0_28, %c0_29] : memref<8x8x128xf32, #tpu.memory_space<vmem>>, vector<1x8x128xf32>
    %97 = vector.shape_cast %96 : vector<1x8x128xf32> to vector<8x128xf32>
    %cst_30 = arith.constant dense<0.000000e+00> : vector<8x128xf32>
    %98 = tpu.matmul %94, %0, %cst_30 {dimension_numbers = #tpu.dot_dimension_numbers<[1], [0], [0], [1], [0, 0, 1, 1], [], []>} : vector<8x32xf32>, vector<32x128xf32>, vector<8x128xf32> -> vector<8x128xf32>
    %99 = arith.addf %97, %98 : vector<8x128xf32>
    %100 = vector.extract_strided_slice %99 {offsets = [0, 0], sizes = [8, 96], strides = [1, 1]} : vector<8x128xf32> to vector<8x96xf32>
    %101 = arith.negf %100 : vector<8x96xf32>
    %102 = math.exp %101 : vector<8x96xf32>
    %cst_31 = arith.constant 1.000000e+00 : f32
    %103 = vector.broadcast %cst_31 : f32 to vector<8x96xf32>
    %104 = arith.addf %103, %102 : vector<8x96xf32>
    %105 = arith.divf %103, %104 : vector<8x96xf32>
    %106 = vector.extract_strided_slice %105 {offsets = [0, 0], sizes = [8, 32], strides = [1, 1]} : vector<8x96xf32> to vector<8x32xf32>
    %107 = vector.extract_strided_slice %105 {offsets = [0, 32], sizes = [8, 32], strides = [1, 1]} : vector<8x96xf32> to vector<8x32xf32>
    %108 = vector.extract_strided_slice %105 {offsets = [0, 64], sizes = [8, 32], strides = [1, 1]} : vector<8x96xf32> to vector<8x32xf32>
    %109 = vector.extract_strided_slice %99 {offsets = [0, 96], sizes = [8, 32], strides = [1, 1]} : vector<8x128xf32> to vector<8x32xf32>
    %110 = math.tanh %109 : vector<8x32xf32>
    %111 = arith.mulf %107, %92 : vector<8x32xf32>
    %112 = arith.mulf %106, %110 : vector<8x32xf32>
    %113 = arith.addf %111, %112 : vector<8x32xf32>
    %114 = math.tanh %113 : vector<8x32xf32>
    %115 = arith.mulf %108, %114 : vector<8x32xf32>
    %c5_i32 = arith.constant 5 : i32
    %116 = arith.index_cast %c5_i32 : i32 to index
    %c0_32 = arith.constant 0 : index
    %c0_33 = arith.constant 0 : index
    %117 = vector.load %arg1[%116, %c0_32, %c0_33] : memref<8x8x128xf32, #tpu.memory_space<vmem>>, vector<1x8x128xf32>
    %118 = vector.shape_cast %117 : vector<1x8x128xf32> to vector<8x128xf32>
    %cst_34 = arith.constant dense<0.000000e+00> : vector<8x128xf32>
    %119 = tpu.matmul %115, %0, %cst_34 {dimension_numbers = #tpu.dot_dimension_numbers<[1], [0], [0], [1], [0, 0, 1, 1], [], []>} : vector<8x32xf32>, vector<32x128xf32>, vector<8x128xf32> -> vector<8x128xf32>
    %120 = arith.addf %118, %119 : vector<8x128xf32>
    %121 = vector.extract_strided_slice %120 {offsets = [0, 0], sizes = [8, 96], strides = [1, 1]} : vector<8x128xf32> to vector<8x96xf32>
    %122 = arith.negf %121 : vector<8x96xf32>
    %123 = math.exp %122 : vector<8x96xf32>
    %cst_35 = arith.constant 1.000000e+00 : f32
    %124 = vector.broadcast %cst_35 : f32 to vector<8x96xf32>
    %125 = arith.addf %124, %123 : vector<8x96xf32>
    %126 = arith.divf %124, %125 : vector<8x96xf32>
    %127 = vector.extract_strided_slice %126 {offsets = [0, 0], sizes = [8, 32], strides = [1, 1]} : vector<8x96xf32> to vector<8x32xf32>
    %128 = vector.extract_strided_slice %126 {offsets = [0, 32], sizes = [8, 32], strides = [1, 1]} : vector<8x96xf32> to vector<8x32xf32>
    %129 = vector.extract_strided_slice %126 {offsets = [0, 64], sizes = [8, 32], strides = [1, 1]} : vector<8x96xf32> to vector<8x32xf32>
    %130 = vector.extract_strided_slice %120 {offsets = [0, 96], sizes = [8, 32], strides = [1, 1]} : vector<8x128xf32> to vector<8x32xf32>
    %131 = math.tanh %130 : vector<8x32xf32>
    %132 = arith.mulf %128, %113 : vector<8x32xf32>
    %133 = arith.mulf %127, %131 : vector<8x32xf32>
    %134 = arith.addf %132, %133 : vector<8x32xf32>
    %135 = math.tanh %134 : vector<8x32xf32>
    %136 = arith.mulf %129, %135 : vector<8x32xf32>
    %c6_i32 = arith.constant 6 : i32
    %137 = arith.index_cast %c6_i32 : i32 to index
    %c0_36 = arith.constant 0 : index
    %c0_37 = arith.constant 0 : index
    %138 = vector.load %arg1[%137, %c0_36, %c0_37] : memref<8x8x128xf32, #tpu.memory_space<vmem>>, vector<1x8x128xf32>
    %139 = vector.shape_cast %138 : vector<1x8x128xf32> to vector<8x128xf32>
    %cst_38 = arith.constant dense<0.000000e+00> : vector<8x128xf32>
    %140 = tpu.matmul %136, %0, %cst_38 {dimension_numbers = #tpu.dot_dimension_numbers<[1], [0], [0], [1], [0, 0, 1, 1], [], []>} : vector<8x32xf32>, vector<32x128xf32>, vector<8x128xf32> -> vector<8x128xf32>
    %141 = arith.addf %139, %140 : vector<8x128xf32>
    %142 = vector.extract_strided_slice %141 {offsets = [0, 0], sizes = [8, 96], strides = [1, 1]} : vector<8x128xf32> to vector<8x96xf32>
    %143 = arith.negf %142 : vector<8x96xf32>
    %144 = math.exp %143 : vector<8x96xf32>
    %cst_39 = arith.constant 1.000000e+00 : f32
    %145 = vector.broadcast %cst_39 : f32 to vector<8x96xf32>
    %146 = arith.addf %145, %144 : vector<8x96xf32>
    %147 = arith.divf %145, %146 : vector<8x96xf32>
    %148 = vector.extract_strided_slice %147 {offsets = [0, 0], sizes = [8, 32], strides = [1, 1]} : vector<8x96xf32> to vector<8x32xf32>
    %149 = vector.extract_strided_slice %147 {offsets = [0, 32], sizes = [8, 32], strides = [1, 1]} : vector<8x96xf32> to vector<8x32xf32>
    %150 = vector.extract_strided_slice %147 {offsets = [0, 64], sizes = [8, 32], strides = [1, 1]} : vector<8x96xf32> to vector<8x32xf32>
    %151 = vector.extract_strided_slice %141 {offsets = [0, 96], sizes = [8, 32], strides = [1, 1]} : vector<8x128xf32> to vector<8x32xf32>
    %152 = math.tanh %151 : vector<8x32xf32>
    %153 = arith.mulf %149, %134 : vector<8x32xf32>
    %154 = arith.mulf %148, %152 : vector<8x32xf32>
    %155 = arith.addf %153, %154 : vector<8x32xf32>
    %156 = math.tanh %155 : vector<8x32xf32>
    %157 = arith.mulf %150, %156 : vector<8x32xf32>
    %c7_i32 = arith.constant 7 : i32
    %158 = arith.index_cast %c7_i32 : i32 to index
    %c0_40 = arith.constant 0 : index
    %c0_41 = arith.constant 0 : index
    %159 = vector.load %arg1[%158, %c0_40, %c0_41] : memref<8x8x128xf32, #tpu.memory_space<vmem>>, vector<1x8x128xf32>
    %160 = vector.shape_cast %159 : vector<1x8x128xf32> to vector<8x128xf32>
    %cst_42 = arith.constant dense<0.000000e+00> : vector<8x128xf32>
    %161 = tpu.matmul %157, %0, %cst_42 {dimension_numbers = #tpu.dot_dimension_numbers<[1], [0], [0], [1], [0, 0, 1, 1], [], []>} : vector<8x32xf32>, vector<32x128xf32>, vector<8x128xf32> -> vector<8x128xf32>
    %162 = arith.addf %160, %161 : vector<8x128xf32>
    %163 = vector.extract_strided_slice %162 {offsets = [0, 0], sizes = [8, 96], strides = [1, 1]} : vector<8x128xf32> to vector<8x96xf32>
    %164 = arith.negf %163 : vector<8x96xf32>
    %165 = math.exp %164 : vector<8x96xf32>
    %cst_43 = arith.constant 1.000000e+00 : f32
    %166 = vector.broadcast %cst_43 : f32 to vector<8x96xf32>
    %167 = arith.addf %166, %165 : vector<8x96xf32>
    %168 = arith.divf %166, %167 : vector<8x96xf32>
    %169 = vector.extract_strided_slice %168 {offsets = [0, 0], sizes = [8, 32], strides = [1, 1]} : vector<8x96xf32> to vector<8x32xf32>
    %170 = vector.extract_strided_slice %168 {offsets = [0, 32], sizes = [8, 32], strides = [1, 1]} : vector<8x96xf32> to vector<8x32xf32>
    %171 = vector.extract_strided_slice %168 {offsets = [0, 64], sizes = [8, 32], strides = [1, 1]} : vector<8x96xf32> to vector<8x32xf32>
    %172 = vector.extract_strided_slice %162 {offsets = [0, 96], sizes = [8, 32], strides = [1, 1]} : vector<8x128xf32> to vector<8x32xf32>
    %173 = math.tanh %172 : vector<8x32xf32>
    %174 = arith.mulf %170, %155 : vector<8x32xf32>
    %175 = arith.mulf %169, %173 : vector<8x32xf32>
    %176 = arith.addf %174, %175 : vector<8x32xf32>
    %177 = math.tanh %176 : vector<8x32xf32>
    %178 = arith.mulf %171, %177 : vector<8x32xf32>
    %c8_i32 = arith.constant 8 : i32
    %c0_44 = arith.constant 0 : index
    %c0_45 = arith.constant 0 : index
    %179 = vector.load %arg2[%c0_44, %c0_45] : memref<8x8xf32, #tpu.memory_space<vmem>>, vector<8x8xf32>
    %cst_46 = arith.constant dense<0.000000e+00> : vector<8x32xf32>
    %180 = tpu.matmul %179, %178, %cst_46 {dimension_numbers = #tpu.dot_dimension_numbers<[1], [0], [0], [1], [0, 0, 1, 1], [], []>} : vector<8x8xf32>, vector<8x32xf32>, vector<8x32xf32> -> vector<8x32xf32>
    %cst_47 = arith.constant dense<0.000000e+00> : vector<8x32xf32>
    %181 = tpu.matmul %180, %3, %cst_47 {dimension_numbers = #tpu.dot_dimension_numbers<[1], [0], [0], [1], [0, 0, 1, 1], [], []>} : vector<8x32xf32>, vector<32x32xf32>, vector<8x32xf32> -> vector<8x32xf32>
    %182 = vector.broadcast %6 : vector<1x32xf32> to vector<8x32xf32>
    %183 = arith.addf %181, %182 : vector<8x32xf32>
    %cst_48 = arith.constant 0.000000e+00 : f32
    %184 = vector.broadcast %cst_48 : f32 to vector<8x32xf32>
    %185 = arith.maximumf %183, %184 : vector<8x32xf32>
    %cst_49 = arith.constant dense<0.000000e+00> : vector<8x96xf32>
    %186 = tpu.matmul %185, %2, %cst_49 {dimension_numbers = #tpu.dot_dimension_numbers<[1], [0], [0], [1], [0, 0, 1, 1], [], []>} : vector<8x32xf32>, vector<32x96xf32>, vector<8x96xf32> -> vector<8x96xf32>
    %187 = vector.broadcast %7 : vector<1x96xf32> to vector<8x96xf32>
    %188 = arith.addf %186, %187 : vector<8x96xf32>
    %189 = vector.extract_strided_slice %188 {offsets = [0, 0], sizes = [8, 32], strides = [1, 1]} : vector<8x96xf32> to vector<8x32xf32>
    %190 = vector.extract_strided_slice %188 {offsets = [0, 32], sizes = [8, 32], strides = [1, 1]} : vector<8x96xf32> to vector<8x32xf32>
    %191 = vector.extract_strided_slice %188 {offsets = [0, 64], sizes = [8, 32], strides = [1, 1]} : vector<8x96xf32> to vector<8x32xf32>
    %192 = tpu.concatenate %189, %189, %189, %189 in 0 : vector<8x32xf32>, vector<8x32xf32>, vector<8x32xf32>, vector<8x32xf32> -> vector<32x32xf32>
    %193 = arith.mulf %192, %4 : vector<32x32xf32>
    %cst_50 = arith.constant dense<0.000000e+00> : vector<32x8xf32>
    %194 = tpu.matmul %193, %190, %cst_50 {dimension_numbers = #tpu.dot_dimension_numbers<[1], [1], [0], [0], [0, 0, 1, 0], [], []>} : vector<32x32xf32>, vector<8x32xf32>, vector<32x8xf32> -> vector<32x8xf32>
    %cst_51 = arith.constant 0.353553385 : f32
    %195 = vector.broadcast %cst_51 : f32 to vector<32x8xf32>
    %196 = arith.mulf %194, %195 : vector<32x8xf32>
    %197 = arith.addf %196, %5 : vector<32x8xf32>
    %cst_52 = arith.constant dense<0xFF800000> : vector<32xf32>
    %198 = vector.multi_reduction <maximumf>, %197, %cst_52 [1] : vector<32x8xf32> to vector<32xf32>
    %199 = vector.shape_cast %198 : vector<32xf32> to vector<32x1xf32>
    %200 = vector.broadcast %199 : vector<32x1xf32> to vector<32x8xf32>
    %201 = arith.subf %197, %200 : vector<32x8xf32>
    %202 = math.exp %201 : vector<32x8xf32>
    %cst_53 = arith.constant dense<0.000000e+00> : vector<32xf32>
    %203 = vector.multi_reduction <add>, %202, %cst_53 [1] : vector<32x8xf32> to vector<32xf32>
    %204 = vector.shape_cast %203 : vector<32xf32> to vector<32x1xf32>
    %205 = tpu.reciprocal %204 {approx = true} : vector<32x1xf32> -> vector<32x1xf32>
    %206 = vector.broadcast %205 : vector<32x1xf32> to vector<32x8xf32>
    %207 = arith.mulf %202, %206 : vector<32x8xf32>
    %208 = vector.extract_strided_slice %207 {offsets = [0, 0], sizes = [8, 8], strides = [1, 1]} : vector<32x8xf32> to vector<8x8xf32>
    %cst_54 = arith.constant dense<0.000000e+00> : vector<8x32xf32>
    %209 = tpu.matmul %208, %191, %cst_54 {dimension_numbers = #tpu.dot_dimension_numbers<[1], [0], [0], [1], [0, 0, 1, 1], [], []>} : vector<8x8xf32>, vector<8x32xf32>, vector<8x32xf32> -> vector<8x32xf32>
    %210 = vector.extract_strided_slice %4 {offsets = [0, 0], sizes = [8, 32], strides = [1, 1]} : vector<32x32xf32> to vector<8x32xf32>
    %211 = arith.mulf %209, %210 : vector<8x32xf32>
    %212 = vector.extract_strided_slice %207 {offsets = [8, 0], sizes = [8, 8], strides = [1, 1]} : vector<32x8xf32> to vector<8x8xf32>
    %cst_55 = arith.constant dense<0.000000e+00> : vector<8x32xf32>
    %213 = tpu.matmul %212, %191, %cst_55 {dimension_numbers = #tpu.dot_dimension_numbers<[1], [0], [0], [1], [0, 0, 1, 1], [], []>} : vector<8x8xf32>, vector<8x32xf32>, vector<8x32xf32> -> vector<8x32xf32>
    %214 = vector.extract_strided_slice %4 {offsets = [8, 0], sizes = [8, 32], strides = [1, 1]} : vector<32x32xf32> to vector<8x32xf32>
    %215 = arith.mulf %213, %214 : vector<8x32xf32>
    %216 = arith.addf %211, %215 : vector<8x32xf32>
    %217 = vector.extract_strided_slice %207 {offsets = [16, 0], sizes = [8, 8], strides = [1, 1]} : vector<32x8xf32> to vector<8x8xf32>
    %cst_56 = arith.constant dense<0.000000e+00> : vector<8x32xf32>
    %218 = tpu.matmul %217, %191, %cst_56 {dimension_numbers = #tpu.dot_dimension_numbers<[1], [0], [0], [1], [0, 0, 1, 1], [], []>} : vector<8x8xf32>, vector<8x32xf32>, vector<8x32xf32> -> vector<8x32xf32>
    %219 = vector.extract_strided_slice %4 {offsets = [16, 0], sizes = [8, 32], strides = [1, 1]} : vector<32x32xf32> to vector<8x32xf32>
    %220 = arith.mulf %218, %219 : vector<8x32xf32>
    %221 = arith.addf %216, %220 : vector<8x32xf32>
    %222 = vector.extract_strided_slice %207 {offsets = [24, 0], sizes = [8, 8], strides = [1, 1]} : vector<32x8xf32> to vector<8x8xf32>
    %cst_57 = arith.constant dense<0.000000e+00> : vector<8x32xf32>
    %223 = tpu.matmul %222, %191, %cst_57 {dimension_numbers = #tpu.dot_dimension_numbers<[1], [0], [0], [1], [0, 0, 1, 1], [], []>} : vector<8x8xf32>, vector<8x32xf32>, vector<8x32xf32> -> vector<8x32xf32>
    %224 = vector.extract_strided_slice %4 {offsets = [24, 0], sizes = [8, 32], strides = [1, 1]} : vector<32x32xf32> to vector<8x32xf32>
    %225 = arith.mulf %223, %224 : vector<8x32xf32>
    %226 = arith.addf %221, %225 : vector<8x32xf32>
    %cst_58 = arith.constant dense<0.000000e+00> : vector<8x128xf32>
    %227 = tpu.matmul %226, %1, %cst_58 {dimension_numbers = #tpu.dot_dimension_numbers<[1], [0], [0], [1], [0, 0, 1, 1], [], []>} : vector<8x32xf32>, vector<32x128xf32>, vector<8x128xf32> -> vector<8x128xf32>
    %228 = vector.broadcast %8 : vector<1x128xf32> to vector<8x128xf32>
    %229 = arith.addf %227, %228 : vector<8x128xf32>
    %c0_59 = arith.constant 0 : index
    %c0_60 = arith.constant 0 : index
    %230 = vector.load %arg5[%c0_59, %c0_60] : memref<8x128xf32, #tpu.memory_space<vmem>>, vector<8x128xf32>
    tpu.vector_store %arg5[%c0_59, %c0_60], %229 {strides = array<i32>} : memref<8x128xf32, #tpu.memory_space<vmem>>, vector<8x128xf32>,
    return
  }
  func.func @transform_0(%arg0: i32) -> (i32, i32, i32) {
    %c0_i32 = arith.constant 0 : i32
    %c0_i32_0 = arith.constant 0 : i32
    %c0_i32_1 = arith.constant 0 : i32
    %c0_i32_2 = arith.constant 0 : i32
    return %c0_i32, %c0_i32_0, %c0_i32_1 : i32, i32, i32
  }
  func.func @transform_1(%arg0: i32) -> (i32, i32) {
    %c0_i32 = arith.constant 0 : i32
    %c0_i32_0 = arith.constant 0 : i32
    %c0_i32_1 = arith.constant 0 : i32
    return %c0_i32, %c0_i32_0 : i32, i32
  }
  func.func @transform_2(%arg0: i32) -> (i32, i32) {
    %c0_i32 = arith.constant 0 : i32
    %c0_i32_0 = arith.constant 0 : i32
    %c0_i32_1 = arith.constant 0 : i32
    return %c0_i32, %c0_i32_0 : i32, i32
  }
  func.func @transform_3(%arg0: i32) -> (i32, i32) {
    %c0_i32 = arith.constant 0 : i32
    %c0_i32_0 = arith.constant 0 : i32
    %c0_i32_1 = arith.constant 0 : i32
    return %c0_i32, %c0_i32_0 : i32, i32
  }
  func.func @transform_4(%arg0: i32) -> (i32, i32) {
    %c0_i32 = arith.constant 0 : i32
    %c0_i32_0 = arith.constant 0 : i32
    %c0_i32_1 = arith.constant 0 : i32
    return %c0_i32, %c0_i32_0 : i32, i32
  }
}

</mosaic_0001>

<bundles_post_ra>
// kernel: predict.1
= control target key start
LH: loop header
LB: loop body
LE: loop exit
PB: predicated region body
PF: predicated region fallthrough
CT: control target
= control target key end

     0   :  { %v2083_v0 = vmov 0.0|0.0   ;;  %vm2084_vm0 = vmmov 0   ;;  %v2085_v4 = vmov 0.0   ;;  %s2086_s25 = smov 32   ;;  %s2087_s26 = smov 64   ;;  %vm36_vm1 = vcmask 261120   ;;  %s2370_s2 = inlined_call_operand.vmem [shape: f32[32,424], index: 2, kind: input, shape index: {}]   ;;  %s2371_s0 = inlined_call_operand.vmem [shape: f32[8,8,128], index: 0, kind: input, shape index: {}]   ;;  %s2372_s1 = inlined_call_operand.vmem [shape: f32[8,8], index: 1, kind: input, shape index: {}]   ;;  %s2373_s3 = inlined_call_operand.vmem [shape: f32[1,256], index: 3, kind: input, shape index: {}]   ;;  %s2374_s4 = inlined_call_operand.vmem [shape: f32[8,128], index: 4, kind: output, shape index: {}]  }
   0x1   :  { %1921 = vmatprep.subr.bf16.mxu0 %v2083_v0  ;;  %v17_v1 = vld [vmem:[%s2370_s2] sm:$0xff]  ;;  %1775 = vmatprep.mubr.msk.f32.mxu0 %vm2084_vm0, %v2085_v4  ;;  %v1661_v26 = vld [vmem:[%s2371_s0 + $0x8] sm:$0xff]  ;;  %v1664_v44 = vld [vmem:[%s2371_s0 + $0x10] sm:$0xff]  ;;  %vm854_vm2 = vcmask 64512  }
   0x2   :  { %v18_v2 = vld [vmem:[%s2370_s2 + $0x20] sm:$0xff]  ;;  %1927 = vmatprep.subr.bf16.mxu1 %v2083_v0  ;;  %1786 = vmatprep.mubr.msk.f32.mxu1 %vm2084_vm0, %v2085_v4  ;;  %v1667_v62 = vld [vmem:[%s2371_s0 + $0x18] sm:$0xff] }
   0x3   :  { %v19_v3 = vld [vmem:[%s2370_s2 + $0x40] sm:$0xff]  ;;  %v2126_v5 = vpack.c.bf16 %v18_v2, %v17_v1 }
   0x4   :  { %v20_v6 = vld [vmem:[%s2370_s2 + $0x60] sm:$0xff] }
   0x5   :  { %1923 = vmatpush3.bf16.msra.mxu0 %v2126_v5  ;;  %v2135_v7 = vpack.c.bf16 %v20_v6, %v19_v3  ;;  %1929 = vmatpush3.bf16.msra.mxu1 %v2126_v5  ;;  %v35_v8 = vld [vmem:[%s2371_s0] sm:$0xff] }
   0x6   :  { %1924 = vmatprep.subr.bf16.mxu0 %v2083_v0  ;;  %1930 = vmatprep.subr.bf16.mxu1 %v2083_v0 }
   0x9   :  { %1926 = vmatpush3.bf16.msra.mxu0 %v2135_v7  ;;  %1932 = vmatpush3.bf16.msra.mxu1 %v2135_v7 }
   0xa   :  { %1933 = vmatprep.subr.bf16.mxu0 %v2083_v0  ;;  %1939 = vmatprep.subr.bf16.mxu1 %v2083_v0 }
   0xc   :  { %1776 = vmatmul.mubr.f32.vlgmr.msra.gmra.mrb[0].mxu0 %v2085_v4 }
   0xd   :  { %1935 = vmatpush3.bf16.msra.mxu0 %v2126_v5  ;;  %1797 = vmatprep.mubr.msk.f32.mxu0 %vm2084_vm0, %v2085_v4 }
   0xe   :  { %1936 = vmatprep.subr.bf16.mxu0 %v2083_v0 }
  0x11   :  { %1938 = vmatpush3.bf16.msra.mxu0 %v2135_v7 }
  0x12   :  { %1945 = vmatprep.subr.bf16.mxu0 %v2083_v0 }
  0xdf   :  { %v106_v9 = vpop.f32.mrb[0].mxu0 }
  0xe0   :  { %v110_v10 = vadd.f32 %v106_v9, %v35_v8  ;;  %v1777_v11 = vpop.f32.mrb[1].mxu0 }
  0xe2   :  { %2003 = vtanh.f32 %v110_v10  ;;  %v1660_v13 = vmul.f32 -1.442695, %v110_v10 }
  0xe4   :  { %2005 = vpow2.f32 %v1660_v13 }
  0xec   :  { %v2004_v12 = vpop.eup %2003 }
  0xed   :  { %120 = vrot.lane.b32.xlu0 %v2004_v12, %s2086_s25 }
  0xee   :  { %v2006_v14 = vpop.eup %2005 }
  0xef   :  { %v114_v15 = vadd.f32 1.0, %v2006_v14 }
  0xf1   :  { %2007 = vrcp.f32 %v114_v15 }
  0xfb   :  { %v2008_v16 = vpop.eup %2007 }
  0xfc   :  { %v118_v19 = vmul.f32 0.0, %v2008_v16 }
 0x15f   :  { %v121_v17 = vpop.permute.xlu0 %120 }
 0x160   :  { %v123_v18 = vmul.f32 %v2008_v16, %v121_v17 }
 0x162   :  { %125 = vrot.lane.b32.xlu0 %v123_v18, %s2086_s25 }
 0x1d4   :  { %v126_v20 = vpop.permute.xlu0 %125 }
 0x1d5   :  { %v128_v21 = vadd.f32 %v126_v20, %v118_v19  ;;  %v1670_v20 = vld [vmem:[%s2371_s0 + $0x20] sm:$0xff] }
 0x1d7   :  { %2009 = vtanh.f32 %v128_v21 }
 0x1e1   :  { %v2010_v22 = vpop.eup %2009 }
 0x1e2   :  { %131 = vrot.lane.b32.xlu1 %v2010_v22, %s2086_s25 }
 0x254   :  { %v132_v23 = vpop.permute.xlu1 %131 }
 0x255   :  { %v134_v24 = vmul.f32 %v2008_v16, %v132_v23 }
 0x257   :  { %138 = vrot.lane.b32.xlu1 %v134_v24, %s2087_s26 }
 0x2c9   :  { %v139_v25 = vpop.permute.xlu1 %138 }
 0x2ca   :  { %1787 = vmatmul.mubr.msk.f32.vlgmr.msra.gmra.mrb[0].mxu1 %vm36_vm1, %v139_v25 }
 0x2cb   :  { %1941 = vmatpush3.bf16.msra.mxu1 %v2126_v5  ;;  %1808 = vmatprep.mubr.msk.f32.mxu1 %vm2084_vm0, %v2085_v4 }
 0x2cc   :  { %1942 = vmatprep.subr.bf16.mxu1 %v2083_v0 }
 0x2cf   :  { %1944 = vmatpush3.bf16.msra.mxu1 %v2135_v7 }
 0x2d0   :  { %1951 = vmatprep.subr.bf16.mxu1 %v2083_v0 }
 0x39d   :  { %v208_v27 = vpop.f32.mrb[0].mxu1 }
 0x39e   :  { %v212_v28 = vadd.f32 %v1661_v26, %v208_v27  ;;  %v1788_v29 = vpop.f32.mrb[1].mxu1 }
 0x3a0   :  { %2011 = vtanh.f32 %v212_v28  ;;  %v1663_v31 = vmul.f32 -1.442695, %v212_v28 }
 0x3a2   :  { %2013 = vpow2.f32 %v1663_v31 }
 0x3aa   :  { %v2012_v30 = vpop.eup %2011 }
 0x3ab   :  { %222 = vrot.lane.b32.xlu0 %v2012_v30, %s2086_s25 }
 0x3ac   :  { %v2014_v32 = vpop.eup %2013 }
 0x3ad   :  { %v216_v33 = vadd.f32 1.0, %v2014_v32 }
 0x3af   :  { %2015 = vrcp.f32 %v216_v33 }
 0x3b9   :  { %v2016_v34 = vpop.eup %2015 }
 0x3ba   :  { %v220_v37 = vmul.f32 %v2016_v34, %v128_v21 }
 0x41d   :  { %v223_v35 = vpop.permute.xlu0 %222 }
 0x41e   :  { %v225_v36 = vmul.f32 %v2016_v34, %v223_v35 }
 0x420   :  { %227 = vrot.lane.b32.xlu1 %v225_v36, %s2086_s25 }
 0x492   :  { %v228_v38 = vpop.permute.xlu1 %227 }
 0x493   :  { %v230_v39 = vadd.f32 %v228_v38, %v220_v37  ;;  %v1673_v38 = vld [vmem:[%s2371_s0 + $0x28] sm:$0xff] }
 0x495   :  { %2017 = vtanh.f32 %v230_v39 }
 0x49f   :  { %v2018_v40 = vpop.eup %2017 }
 0x4a0   :  { %233 = vrot.lane.b32.xlu0 %v2018_v40, %s2086_s25 }
 0x512   :  { %v234_v41 = vpop.permute.xlu0 %233 }
 0x513   :  { %v236_v42 = vmul.f32 %v2016_v34, %v234_v41 }
 0x515   :  { %240 = vrot.lane.b32.xlu1 %v236_v42, %s2087_s26 }
 0x587   :  { %v241_v43 = vpop.permute.xlu1 %240 }
 0x588   :  { %1798 = vmatmul.mubr.msk.f32.vlgmr.msra.gmra.mrb[2].mxu0 %vm36_vm1, %v241_v43 }
 0x589   :  { %1947 = vmatpush3.bf16.msra.mxu0 %v2126_v5  ;;  %1819 = vmatprep.mubr.msk.f32.mxu0 %vm2084_vm0, %v2085_v4 }
 0x58a   :  { %1948 = vmatprep.subr.bf16.mxu0 %v2083_v0 }
 0x58d   :  { %1950 = vmatpush3.bf16.msra.mxu0 %v2135_v7 }
 0x58e   :  { %1957 = vmatprep.subr.bf16.mxu0 %v2083_v0 }
 0x65b   :  { %v310_v45 = vpop.f32.mrb[2].mxu0 }
 0x65c   :  { %v314_v46 = vadd.f32 %v1664_v44, %v310_v45  ;;  %v1799_v47 = vpop.f32.mrb[3].mxu0 }
 0x65e   :  { %2019 = vtanh.f32 %v314_v46  ;;  %v1666_v49 = vmul.f32 -1.442695, %v314_v46 }
 0x660   :  { %2021 = vpow2.f32 %v1666_v49 }
 0x668   :  { %v2020_v48 = vpop.eup %2019 }
 0x669   :  { %324 = vrot.lane.b32.xlu0 %v2020_v48, %s2086_s25 }
 0x66a   :  { %v2022_v50 = vpop.eup %2021 }
 0x66b   :  { %v318_v51 = vadd.f32 1.0, %v2022_v50 }
 0x66d   :  { %2023 = vrcp.f32 %v318_v51 }
 0x677   :  { %v2024_v52 = vpop.eup %2023 }
 0x678   :  { %v322_v55 = vmul.f32 %v2024_v52, %v230_v39 }
 0x6db   :  { %v325_v53 = vpop.permute.xlu0 %324 }
 0x6dc   :  { %v327_v54 = vmul.f32 %v2024_v52, %v325_v53 }
 0x6de   :  { %329 = vrot.lane.b32.xlu1 %v327_v54, %s2086_s25  ;;  %v1676_v54 = vld [vmem:[%s2371_s0 + $0x30] sm:$0xff] }
 0x750   :  { %v330_v56 = vpop.permute.xlu1 %329 }
 0x751   :  { %v332_v57 = vadd.f32 %v330_v56, %v322_v55 }
 0x753   :  { %2025 = vtanh.f32 %v332_v57 }
 0x75d   :  { %v2026_v58 = vpop.eup %2025 }
 0x75e   :  { %335 = vrot.lane.b32.xlu0 %v2026_v58, %s2086_s25 }
 0x7d0   :  { %v336_v59 = vpop.permute.xlu0 %335 }
 0x7d1   :  { %v338_v60 = vmul.f32 %v2024_v52, %v336_v59 }
 0x7d3   :  { %342 = vrot.lane.b32.xlu1 %v338_v60, %s2087_s26 }
 0x845   :  { %v343_v61 = vpop.permute.xlu1 %342 }
 0x846   :  { %1809 = vmatmul.mubr.msk.f32.vlgmr.msra.gmra.mrb[2].mxu1 %vm36_vm1, %v343_v61 }
 0x847   :  { %1953 = vmatpush3.bf16.msra.mxu1 %v2126_v5  ;;  %1830 = vmatprep.mubr.msk.f32.mxu1 %vm2084_vm0, %v2085_v4 }
 0x848   :  { %1954 = vmatprep.subr.bf16.mxu1 %v2083_v0 }
 0x84b   :  { %1956 = vmatpush3.bf16.msra.mxu1 %v2135_v7 }
 0x84c   :  { %1963 = vmatprep.subr.bf16.mxu1 %v2083_v0 }
 0x919   :  { %v412_v63 = vpop.f32.mrb[2].mxu1 }
 0x91a   :  { %v416_v1 = vadd.f32 %v1667_v62, %v412_v63  ;;  %v1810_v2 = vpop.f32.mrb[3].mxu1 }
 0x91c   :  { %2027 = vtanh.f32 %v416_v1  ;;  %v1669_v6 = vmul.f32 -1.442695, %v416_v1 }
 0x91e   :  { %2029 = vpow2.f32 %v1669_v6 }
 0x926   :  { %v2028_v3 = vpop.eup %2027 }
 0x927   :  { %426 = vrot.lane.b32.xlu0 %v2028_v3, %s2086_s25 }
 0x928   :  { %v2030_v8 = vpop.eup %2029 }
 0x929   :  { %v420_v9 = vadd.f32 1.0, %v2030_v8 }
 0x92b   :  { %2031 = vrcp.f32 %v420_v9 }
 0x935   :  { %v2032_v10 = vpop.eup %2031 }
 0x936   :  { %v424_v13 = vmul.f32 %v2032_v10, %v332_v57 }
 0x999   :  { %v427_v11 = vpop.permute.xlu0 %426 }
 0x99a   :  { %v429_v12 = vmul.f32 %v2032_v10, %v427_v11 }
 0x99c   :  { %431 = vrot.lane.b32.xlu1 %v429_v12, %s2086_s25  ;;  %v1679_v12 = vld [vmem:[%s2371_s0 + $0x38] sm:$0xff] }
 0xa0e   :  { %v432_v14 = vpop.permute.xlu1 %431 }
 0xa0f   :  { %v434_v15 = vadd.f32 %v432_v14, %v424_v13 }
 0xa11   :  { %2033 = vtanh.f32 %v434_v15 }
 0xa1b   :  { %v2034_v16 = vpop.eup %2033 }
 0xa1c   :  { %437 = vrot.lane.b32.xlu0 %v2034_v16, %s2086_s25 }
 0xa8e   :  { %v438_v17 = vpop.permute.xlu0 %437 }
 0xa8f   :  { %v440_v18 = vmul.f32 %v2032_v10, %v438_v17 }
 0xa91   :  { %444 = vrot.lane.b32.xlu1 %v440_v18, %s2087_s26 }
 0xb03   :  { %v445_v19 = vpop.permute.xlu1 %444 }
 0xb04   :  { %1820 = vmatmul.mubr.msk.f32.vlgmr.msra.gmra.mrb[4].mxu0 %vm36_vm1, %v445_v19 }
 0xb05   :  { %1959 = vmatpush3.bf16.msra.mxu0 %v2126_v5  ;;  %1841 = vmatprep.mubr.msk.f32.mxu0 %vm2084_vm0, %v2085_v4 }
 0xb06   :  { %1960 = vmatprep.subr.bf16.mxu0 %v2083_v0 }
 0xb09   :  { %1962 = vmatpush3.bf16.msra.mxu0 %v2135_v7 }
 0xb0a   :  { %1855 = vmatprep.subr.mxu0 %v2085_v4 }
 0xbd7   :  { %v514_v21 = vpop.f32.mrb[4].mxu0 }
 0xbd8   :  { %v518_v22 = vadd.f32 %v1670_v20, %v514_v21  ;;  %v1821_v23 = vpop.f32.mrb[5].mxu0 }
 0xbda   :  { %2035 = vtanh.f32 %v518_v22  ;;  %v1672_v25 = vmul.f32 -1.442695, %v518_v22 }
 0xbdc   :  { %2037 = vpow2.f32 %v1672_v25 }
 0xbe4   :  { %v2036_v24 = vpop.eup %2035 }
 0xbe5   :  { %528 = vrot.lane.b32.xlu0 %v2036_v24, %s2086_s25 }
 0xbe6   :  { %v2038_v26 = vpop.eup %2037 }
 0xbe7   :  { %v522_v27 = vadd.f32 1.0, %v2038_v26 }
 0xbe9   :  { %2039 = vrcp.f32 %v522_v27  ;;  %v25_v27 = vld [vmem:[%s2370_s2 + $0x10] sm:$0xff] }
 0xbf3   :  { %v2040_v28 = vpop.eup %2039 }
 0xbf4   :  { %v526_v31 = vmul.f32 %v2040_v28, %v434_v15 }
 0xc57   :  { %v529_v29 = vpop.permute.xlu0 %528 }
 0xc58   :  { %v531_v30 = vmul.f32 %v2040_v28, %v529_v29 }
 0xc5a   :  { %533 = vrot.lane.b32.xlu1 %v531_v30, %s2086_s25 }
 0xccc   :  { %v534_v32 = vpop.permute.xlu1 %533 }
 0xccd   :  { %v536_v33 = vadd.f32 %v534_v32, %v526_v31  ;;  %v27_v31 = vld [vmem:[%s2370_s2 + $0x50] sm:$0xff] }
 0xcce   :  { %v28_v32 = vld [vmem:[%s2370_s2 + $0x70] sm:$0xff] }
 0xccf   :  { %2041 = vtanh.f32 %v536_v33 }
 0xcd9   :  { %v2042_v34 = vpop.eup %2041 }
 0xcda   :  { %539 = vrot.lane.b32.xlu0 %v2042_v34, %s2086_s25 }
 0xd4c   :  { %v540_v35 = vpop.permute.xlu0 %539 }
 0xd4d   :  { %v542_v36 = vmul.f32 %v2040_v28, %v540_v35  ;;  %v26_v28 = vld [vmem:[%s2370_s2 + $0x30] sm:$0xff] }
 0xd4e   :  { %v1993_v29 = vpack.i.bf16 %v26_v28, %v25_v27  ;;  %v1976_v30 = vpack.c.bf16 %v26_v28, %v25_v27 }
 0xd4f   :  { %546 = vrot.lane.b32.xlu1 %v542_v36, %s2087_s26  ;;  %v1998_v36 = vpack.i.bf16 %v28_v32, %v27_v31 }
 0xdc1   :  { %v547_v37 = vpop.permute.xlu1 %546 }
 0xdc2   :  { %1831 = vmatmul.mubr.msk.f32.vlgmr.msra.gmra.mrb[4].mxu1 %vm36_vm1, %v547_v37 }
 0xdc3   :  { %1965 = vmatpush3.bf16.msra.mxu1 %v2126_v5  ;;  %1852 = vmatprep.mubr.msk.f32.mxu1 %vm2084_vm0, %v2085_v4 }
 0xdc4   :  { %1966 = vmatprep.subr.bf16.mxu1 %v2083_v0 }
 0xdc7   :  { %1968 = vmatpush3.bf16.msra.mxu1 %v2135_v7 }
 0xdc8   :  { %1969 = vmatprep.subr.bf16.mxu1 %v2083_v0 }
 0xe95   :  { %v616_v39 = vpop.f32.mrb[4].mxu1 }
 0xe96   :  { %v620_v40 = vadd.f32 %v1673_v38, %v616_v39  ;;  %v1832_v41 = vpop.f32.mrb[5].mxu1 }
 0xe97   :  { %v849_v41 = vld [vmem:[%s2372_s1] sm:$0xff] }
 0xe98   :  { %2043 = vtanh.f32 %v620_v40  ;;  %v1675_v5 = vmul.f32 -1.442695, %v620_v40 }
 0xe9a   :  { %2045 = vpow2.f32 %v1675_v5 }
 0xea2   :  { %v2044_v42 = vpop.eup %2043 }
 0xea3   :  { %630 = vrot.lane.b32.xlu0 %v2044_v42, %s2086_s25 }
 0xea4   :  { %v2046_v43 = vpop.eup %2045 }
 0xea5   :  { %v624_v44 = vadd.f32 1.0, %v2046_v43 }
 0xea7   :  { %2047 = vrcp.f32 %v624_v44 }
 0xeb1   :  { %v2048_v45 = vpop.eup %2047 }
 0xeb2   :  { %v628_v47 = vmul.f32 %v2048_v45, %v536_v33  ;;  %v1979_v33 = vpack.c.bf16 %v28_v32, %v27_v31 }
 0xf15   :  { %v631_v7 = vpop.permute.xlu0 %630 }
 0xf16   :  { %v633_v46 = vmul.f32 %v2048_v45, %v631_v7 }
 0xf18   :  { %635 = vrot.lane.b32.xlu1 %v633_v46, %s2086_s25 }
 0xf8a   :  { %v636_v48 = vpop.permute.xlu1 %635 }
 0xf8b   :  { %v638_v49 = vadd.f32 %v636_v48, %v628_v47  ;;  %v1683_v47 = vld [vmem:[%s2373_s3] ss:$0 sm:$0xff] }
 0xf8d   :  { %2049 = vtanh.f32 %v638_v49 }
 0xf97   :  { %v2050_v50 = vpop.eup %2049 }
 0xf98   :  { %641 = vrot.lane.b32.xlu0 %v2050_v50, %s2086_s25 }
0x100a   :  { %v642_v51 = vpop.permute.xlu0 %641 }
0x100b   :  { %v644_v52 = vmul.f32 %v2048_v45, %v642_v51 }
0x100d   :  { %648 = vrot.lane.b32.xlu1 %v644_v52, %s2087_s26  ;;  %v2282_v52 = vld [vmem:[%s2370_s2 + $0x18] sm:$0xff] }
0x107f   :  { %v649_v53 = vpop.permute.xlu1 %648 }
0x1080   :  { %1842 = vmatmul.mubr.msk.f32.vlgmr.msra.gmra.mrb[6].mxu0 %vm36_vm1, %v649_v53  ;;  %v2288_v53 = vld [vmem:[%s2370_s2 + $0x58] sm:$0xff] }
0x1081   :  { %1857 = vmatprep.mubr.msk.f32.mxu0 %vm2084_vm0, %v2085_v4 }
0x1153   :  { %v718_v55 = vpop.f32.mrb[6].mxu0 }
0x1154   :  { %v722_v56 = vadd.f32 %v1676_v54, %v718_v55  ;;  %v1843_v57 = vpop.f32.mrb[7].mxu0 }
0x1156   :  { %2051 = vtanh.f32 %v722_v56  ;;  %v1678_v59 = vmul.f32 -1.442695, %v722_v56 }
0x1158   :  { %2053 = vpow2.f32 %v1678_v59  ;;  %v2300_v59 = vld [vmem:[%s2370_s2 + $0x38] sm:$0xff] }
0x1160   :  { %v2052_v58 = vpop.eup %2051 }
0x1161   :  { %732 = vrot.lane.b32.xlu0 %v2052_v58, %s2086_s25 }
0x1162   :  { %v2054_v60 = vpop.eup %2053 }
0x1163   :  { %v726_v61 = vadd.f32 1.0, %v2054_v60  ;;  %v2306_v60 = vld [vmem:[%s2370_s2 + $0x78] sm:$0xff] }
0x1165   :  { %2055 = vrcp.f32 %v726_v61 }
0x116f   :  { %v2056_v62 = vpop.eup %2055 }
0x1170   :  { %v730_v2 = vmul.f32 %v2056_v62, %v638_v49 }
0x11d3   :  { %v733_v63 = vpop.permute.xlu0 %732 }
0x11d4   :  { %v735_v1 = vmul.f32 %v2056_v62, %v733_v63 }
0x11d6   :  { %737 = vrot.lane.b32.xlu1 %v735_v1, %s2086_s25 }
0x1248   :  { %v738_v3 = vpop.permute.xlu1 %737 }
0x1249   :  { %v740_v6 = vadd.f32 %v738_v3, %v730_v2 }
0x124b   :  { %2057 = vtanh.f32 %v740_v6 }
0x1255   :  { %v2058_v8 = vpop.eup %2057 }
0x1256   :  { %743 = vrot.lane.b32.xlu0 %v2058_v8, %s2086_s25 }
0x12c8   :  { %v744_v9 = vpop.permute.xlu0 %743 }
0x12c9   :  { %v746_v10 = vmul.f32 %v2056_v62, %v744_v9 }
0x12cb   :  { %750 = vrot.lane.b32.xlu1 %v746_v10, %s2087_s26 }
0x133d   :  { %v751_v11 = vpop.permute.xlu1 %750 }
0x133e   :  { %1853 = vmatmul.mubr.msk.f32.vlgmr.msra.gmra.mrb[6].mxu1 %vm36_vm1, %v751_v11 }
0x133f   :  { %1868 = vmatprep.mubr.msk.f32.mxu1 %vm2084_vm0, %v2085_v4 }
0x1411   :  { %v820_v13 = vpop.f32.mrb[6].mxu1 }
0x1412   :  { %v824_v14 = vadd.f32 %v1679_v12, %v820_v13  ;;  %v1854_v15 = vpop.f32.mrb[7].mxu1 }
0x1414   :  { %2059 = vtanh.f32 %v824_v14  ;;  %v1681_v17 = vmul.f32 -1.442695, %v824_v14 }
0x1416   :  { %2061 = vpow2.f32 %v1681_v17 }
0x141e   :  { %v2060_v16 = vpop.eup %2059 }
0x141f   :  { %834 = vrot.lane.b32.xlu0 %v2060_v16, %s2086_s25 }
0x1420   :  { %v2062_v18 = vpop.eup %2061 }
0x1421   :  { %v828_v19 = vadd.f32 1.0, %v2062_v18 }
0x1423   :  { %2063 = vrcp.f32 %v828_v19 }
0x142d   :  { %v2064_v20 = vpop.eup %2063 }
0x142e   :  { %v832_v23 = vmul.f32 %v2064_v20, %v740_v6 }
0x1491   :  { %v835_v21 = vpop.permute.xlu0 %834 }
0x1492   :  { %v837_v22 = vmul.f32 %v2064_v20, %v835_v21 }
0x1494   :  { %839 = vrot.lane.b32.xlu1 %v837_v22, %s2086_s25 }
0x1506   :  { %v840_v24 = vpop.permute.xlu1 %839 }
0x1507   :  { %v842_v25 = vadd.f32 %v840_v24, %v832_v23 }
0x1509   :  { %2065 = vtanh.f32 %v842_v25 }
0x1513   :  { %v2066_v26 = vpop.eup %2065 }
0x1514   :  { %845 = vrot.lane.b32.xlu0 %v2066_v26, %s2086_s25 }
0x1518   :  { %1994 = vrot.lane.b32.xlu0 %v1993_v29, %s2086_s25 }
0x1586   :  { %v846_v34 = vpop.permute.xlu0 %845 }
0x1587   :  { %v848_v35 = vmul.f32 %v2064_v20, %v846_v34 }
0x1589   :  { %851 = vrot.lane.b32.xlu1 %v848_v35, %s2087_s26 }
0x158a   :  { %v1995_v37 = vpop.permute.xlu0 %1994 }
0x158b   :  { %v1997_v38 = vunpack.i.h.bf16 %v1995_v37  ;;  %v1996_v39 = vunpack.i.l.bf16 %v1995_v37 }
0x158d   :  { %1999 = vrot.lane.b32.xlu1 %v1998_v36, %s2086_s25  ;;  %v1970_v40 = vpack.c.bf16 %v1997_v38, %v1996_v39  ;;  %s2088_s25 = smov 96  }
0x158e   :  { %1024 = vrot.lane.b32.xlu0 %v1683_v47, %s2088_s25 }
0x158f   :  { %1971 = vmatpush3.bf16.msra.mxu1 %v1970_v40 }
0x1590   :  { %1972 = vmatprep.subr.bf16.mxu1 %v2083_v0 }
0x1592   :  { %1214 = vrot.lane.b32.xlu0 %v2282_v52, %s2088_s25 }
0x1596   :  { %1218 = vrot.lane.b32.xlu0 %v2288_v53, %s2088_s25 }
0x15fb   :  { %v852_v42 = vpop.permute.xlu1 %851 }
0x15fc   :  { %1856 = vmatpush3.msra.mxu0 %v852_v42 }
0x15fd   :  { %1858 = vmatmul.mubr.msk.f32.vlgmr.msra.gmra.mrb[8].mxu0 %vm854_vm2, %v849_v41  ;;  %1975 = vmatprep.subr.bf16.mxu0 %v2083_v0 }
0x15fe   :  { %1977 = vmatpush3.bf16.msra.mxu0 %v1976_v30  ;;  %1879 = vmatprep.mubr.msk.f32.mxu0 %vm2084_vm0, %v2085_v4 }
0x15ff   :  { %v2000_v5 = vpop.permute.xlu1 %1999  ;;  %1978 = vmatprep.subr.bf16.mxu0 %v2083_v0 }
0x1600   :  { %v2002_v43 = vunpack.i.h.bf16 %v2000_v5  ;;  %v2001_v44 = vunpack.i.l.bf16 %v2000_v5  ;;  %v1025_v54 = vpop.permute.xlu0 %1024 }
0x1602   :  { %v1973_v45 = vpack.c.bf16 %v2002_v43, %v2001_v44  ;;  %1980 = vmatpush3.bf16.msra.mxu0 %v1979_v33 }
0x1603   :  { %1890 = vmatprep.subr.mxu0 %v2085_v4 }
0x1604   :  { %1974 = vmatpush3.bf16.msra.mxu1 %v1973_v45  ;;  %v1215_v2 = vpop.permute.xlu0 %1214 }
0x1608   :  { %v1219_v16 = vpop.permute.xlu0 %1218 }
0x16d0   :  { %v924_v7 = vpop.f32.mrb[8].mxu0 }
0x16d1   :  { %1869 = vmatmul.mubr.msk.f32.vlgmr.msra.gmra.mrb[8].mxu1 %vm36_vm1, %v924_v7  ;;  %v1859_v46 = vpop.f32.mrb[9].mxu0 }
0x17a4   :  { %v1019_v48 = vpop.f32.mrb[8].mxu1 }
0x17a5   :  { %v1020_v49 = vadd.f32 %v1683_v47, %v1019_v48  ;;  %v1870_v50 = vpop.f32.mrb[9].mxu1 }
0x17a7   :  { %v1023_v51 = vmax.f32 %v1020_v49, 0.0 }
0x17a9   :  { %1880 = vmatmul.mubr.msk.f32.vlgmr.msra.gmra.mrb[10].mxu0 %vm36_vm1, %v1023_v51 }
0x17aa   :  { %1892 = vmatprep.mubr.msk.f32.mxu0 %vm2084_vm0, %v2085_v4 }
0x187c   :  { %v1096_v55 = vpop.f32.mrb[10].mxu0 }
0x187d   :  { %v2291_v56 = vadd.f32 %v1096_v55, %v1025_v54  ;;  %v1881_v57 = vpop.f32.mrb[11].mxu0 }
0x187f   :  { %1105 = vrot.lane.b32.xlu1 %v2291_v56, %s2088_s25  ;;  %v1100_v58 = vmul.f32 %v2291_v56, %v2282_v52  ;;  %v1101_v62 = vmul.f32 %v2291_v56, %v2300_v59  ;;  %v1102_v63 = vmul.f32 %v2291_v56, %v2288_v53  ;;  %v1103_v1 = vmul.f32 %v2291_v56, %v2306_v60 }
0x1881   :  { %1884 = vmatprep.mubr.msk.f32.mxu1 %vm36_vm1, %v1100_v58  ;;  %v21_v58 = vld [vmem:[%s2370_s2 + $0x8] sm:$0xff] }
0x1883   :  { %1216 = vrot.lane.b32.xlu1 %v2300_v59, %s2088_s25 }
0x1887   :  { %1220 = vrot.lane.b32.xlu1 %v2306_v60, %s2088_s25 }
0x18f1   :  { %v1106_v61 = vpop.permute.xlu1 %1105 }
0x18f2   :  { %1882 = vmatprep.subr.msk.mxu1 %vm36_vm1, %v1106_v61 }
0x18f3   :  { %1883 = vmatpush3.xpose.msk.msra.mxu1 %vm36_vm1, %v1106_v61  ;;  %v22_v61 = vld [vmem:[%s2370_s2 + $0x28] sm:$0xff] }
0x18f4   :  { %1900 = vmatprep.subr.mxu1 %v2085_v4 }
0x18f5   :  { %v1217_v6 = vpop.permute.xlu1 %1216 }
0x18f6   :  { %1885 = vmatmul.mubr.msk.f32.vlgmr.msra.gmra.mrb[10].mxu1 %vm36_vm1, %v1101_v62  ;;  %v1982_v62 = vpack.c.bf16 %v22_v61, %v21_v58 }
0x18f7   :  { %1887 = vmatprep.mubr.msk.f32.mxu1 %vm36_vm1, %v1102_v63  ;;  %v23_v63 = vld [vmem:[%s2370_s2 + $0x48] sm:$0xff] }
0x18f9   :  { %v1221_v20 = vpop.permute.xlu1 %1220 }
0x18fa   :  { %1888 = vmatmul.mubr.msk.f32.gmra.mrb[12].mxu1 %vm36_vm1, %v1103_v1 }
0x18fb   :  { %1902 = vmatprep.mubr.msk.f32.mxu1 %vm2084_vm0, %v2085_v4 }
0x19c9   :  { %v1886_v3 = vpop.f32.mrb[10].mxu1 }
0x19ca   :  { %v1207_v8 = vmul.f32 0.35355338, %v1886_v3  ;;  %v1187_v9 = vpop.f32.mrb[11].mxu1 }
0x19cb   :  { %v1206_v10 = vmul.f32 0.35355338, %v1187_v9 }
0x19cc   :  { %v1227_v11 = vadd.f32 %v1217_v6, %v1207_v8 }
0x19cd   :  { %v1226_v12 = vadd.f32 %v1215_v2, %v1206_v10  ;;  %v1889_v13 = vpop.f32.mrb[12].mxu1 }
0x19ce   :  { %v1197_v14 = vpop.f32.mrb[13].mxu1  ;;  %v1233_v15 = vsel %vm854_vm2, %v1227_v11, -inf  ;;  %v1209_v17 = vmul.f32 0.35355338, %v1889_v13 }
0x19cf   :  { %v1208_v18 = vmul.f32 0.35355338, %v1197_v14  ;;  %1234 = vmax.xlane.f32.xlu1 %v1233_v15  ;;  %v1230_v19 = vsel %vm854_vm2, %v1226_v12, -inf }
0x19d0   :  { %1231 = vmax.xlane.f32.xlu0 %v1230_v19  ;;  %v1229_v22 = vadd.f32 %v1221_v20, %v1209_v17  ;;  %v1695_v19 = vld [vmem:[%s2373_s3 + $0x1] ss:$0 sm:$0xff] }
0x19d1   :  { %v1228_v21 = vadd.f32 %v1219_v16, %v1208_v18 }
0x19d2   :  { %v1239_v24 = vsel %vm854_vm2, %v1229_v22, -inf }
0x19d3   :  { %v1236_v23 = vsel %vm854_vm2, %v1228_v21, -inf }
0x19d4   :  { %1237 = vmax.xlane.f32.xlu0 %v1236_v23 }
0x19d8   :  { %1240 = vmax.xlane.f32.xlu0 %v1239_v24 }
0x1a5c   :  { %v1235_v25 = vpop.xlane.xlu1 %1234 }
0x1a5d   :  { %v1243_v26 = vsub.f32 %v1227_v11, %v1235_v25  ;;  %v1232_v27 = vpop.xlane.xlu0 %1231 }
0x1a5e   :  { %v1242_v28 = vsub.f32 %v1226_v12, %v1232_v27 }
0x1a5f   :  { %v1248_v29 = vmul.f32 1.442695, %v1243_v26 }
0x1a60   :  { %v1246_v30 = vmul.f32 1.442695, %v1242_v28 }
0x1a61   :  { %2067 = vpow2.f32 %v1248_v29  ;;  %v1238_v31 = vpop.xlane.xlu0 %1237 }
0x1a62   :  { %2069 = vpow2.f32 %v1246_v30  ;;  %v1244_v32 = vsub.f32 %v1228_v21, %v1238_v31 }
0x1a64   :  { %v1250_v33 = vmul.f32 1.442695, %v1244_v32 }
0x1a65   :  { %v1241_v34 = vpop.xlane.xlu0 %1240 }
0x1a66   :  { %2071 = vpow2.f32 %v1250_v33  ;;  %v1245_v35 = vsub.f32 %v1229_v22, %v1241_v34 }
0x1a68   :  { %v1252_v36 = vmul.f32 1.442695, %v1245_v35 }
0x1a6a   :  { %2073 = vpow2.f32 %v1252_v36 }
0x1a6b   :  { %v2068_v37 = vpop.eup %2067 }
0x1a6c   :  { %v2070_v38 = vpop.eup %2069  ;;  %v1257_v39 = vsel %vm854_vm2, %v2068_v37, 0.0 }
0x1a6d   :  { %1258 = vadd.xlane.f32.xlu0 %v1257_v39  ;;  %v1254_v40 = vsel %vm854_vm2, %v2070_v38, 0.0 }
0x1a6e   :  { %1255 = vadd.xlane.f32.xlu1 %v1254_v40 }
0x1a70   :  { %v2072_v41 = vpop.eup %2071 }
0x1a71   :  { %v1260_v42 = vsel %vm854_vm2, %v2072_v41, 0.0 }
0x1a72   :  { %1261 = vadd.xlane.f32.xlu1 %v1260_v42 }
0x1a74   :  { %v2074_v5 = vpop.eup %2073 }
0x1a75   :  { %v1263_v43 = vsel %vm854_vm2, %v2074_v5, 0.0 }
0x1a76   :  { %1264 = vadd.xlane.f32.xlu0 %v1263_v43 }
0x1a83   :  { %1274 = vrot.lane.b32.xlu1 %v2291_v56, %s2087_s26 }
0x1afa   :  { %v1259_v44 = vpop.xlane.xlu0 %1258 }
0x1afb   :  { %v1256_v45 = vpop.xlane.xlu1 %1255 }
0x1afc   :  { %2075 = vrcp.f32 %v1256_v45 }
0x1afd   :  { %2077 = vrcp.f32 %v1259_v44 }
0x1aff   :  { %v1262_v7 = vpop.xlane.xlu1 %1261 }
0x1b00   :  { %2079 = vrcp.f32 %v1262_v7 }
0x1b03   :  { %v1275_v46 = vpop.permute.xlu1 %1274  ;;  %v1265_v47 = vpop.xlane.xlu0 %1264 }
0x1b04   :  { %2081 = vrcp.f32 %v1265_v47  ;;  %1891 = vmatpush3.msra.mxu0 %v1275_v46  ;;  %1901 = vmatpush3.msra.mxu1 %v1275_v46 }
0x1b05   :  { %1895 = vmatprep.subr.mxu0 %v2085_v4  ;;  %1981 = vmatprep.subr.bf16.mxu1 %v2083_v0 }
0x1b06   :  { %v2076_v48 = vpop.eup %2075 }
0x1b07   :  { %v1270_v49 = vmul.f32 %v2076_v48, %v2070_v38  ;;  %v2078_v50 = vpop.eup %2077 }
0x1b08   :  { %v1271_v54 = vmul.f32 %v2078_v50, %v2068_v37 }
0x1b09   :  { %1893 = vmatmul.mubr.msk.f32.vlgmr.msra.gmra.mrb[12].mxu0 %vm854_vm2, %v1270_v49 }
0x1b0a   :  { %v2080_v51 = vpop.eup %2079  ;;  %1896 = vmatpush3.msra.mxu0 %v1275_v46  ;;  %1897 = vmatprep.mubr.msk.f32.mxu0 %vm2084_vm0, %v2085_v4 }
0x1b0b   :  { %v1272_v55 = vmul.f32 %v2080_v51, %v2072_v41  ;;  %1905 = vmatprep.subr.mxu0 %v2085_v4 }
0x1b0d   :  { %1898 = vmatmul.mubr.msk.f32.vlgmr.msra.gmra.mrb[14].mxu0 %vm854_vm2, %v1271_v54  ;;  %1903 = vmatmul.mubr.msk.f32.vlgmr.msra.gmra.mrb[14].mxu1 %vm854_vm2, %v1272_v55 }
0x1b0e   :  { %v2082_v56 = vpop.eup %2081  ;;  %1906 = vmatpush3.msra.mxu0 %v1275_v46  ;;  %1907 = vmatprep.mubr.msk.f32.mxu0 %vm2084_vm0, %v2085_v4 }
0x1b0f   :  { %v1273_v57 = vmul.f32 %v2082_v56, %v2074_v5  ;;  %1918 = vmatprep.mubr.msk.f32.mxu1 %vm2084_vm0, %v2085_v4  ;;  %1983 = vmatpush3.bf16.msra.mxu1 %v1982_v62  ;;  %v24_v4 = vld [vmem:[%s2370_s2 + $0x68] sm:$0xff] }
0x1b10   :  { %1984 = vmatprep.subr.bf16.mxu1 %v2083_v0  ;;  %v1985_v1 = vpack.c.bf16 %v24_v4, %v23_v63 }
0x1b11   :  { %1908 = vmatmul.mubr.msk.f32.vlgmr.msra.gmra.mrb[16].mxu0 %vm854_vm2, %v1273_v57 }
0x1b13   :  { %1986 = vmatpush3.bf16.msra.mxu1 %v1985_v1 }
0x1bdc   :  { %v1346_v2 = vpop.f32.mrb[12].mxu0 }
0x1bdd   :  { %v1894_v3 = vpop.f32.mrb[13].mxu0  ;;  %v1350_v9 = vmul.f32 %v1346_v2, %v2282_v52 }
0x1be0   :  { %v1420_v6 = vpop.f32.mrb[14].mxu0  ;;  %v1495_v8 = vpop.f32.mrb[14].mxu1 }
0x1be1   :  { %v1424_v10 = vmul.f32 %v1420_v6, %v2300_v59  ;;  %v1899_v11 = vpop.f32.mrb[15].mxu0  ;;  %v1904_v0 = vpop.f32.mrb[15].mxu1  ;;  %v1499_v13 = vmul.f32 %v1495_v8, %v2288_v53 }
0x1be3   :  { %v1425_v12 = vadd.f32 %v1424_v10, %v1350_v9 }
0x1be4   :  { %v1570_v14 = vpop.f32.mrb[16].mxu0 }
0x1be5   :  { %v1500_v15 = vadd.f32 %v1499_v13, %v1425_v12  ;;  %v1574_v16 = vmul.f32 %v1570_v14, %v2306_v60  ;;  %v1909_v17 = vpop.f32.mrb[17].mxu0 }
0x1be7   :  { %v1575_v18 = vadd.f32 %v1574_v16, %v1500_v15 }
0x1be9   :  { %1919 = vmatmul.mubr.msk.f32.vlgmr.msra.gmra.mrb[16].mxu1 %vm36_vm1, %v1575_v18 }
0x1cbc   :  { %v1651_v52 = vpop.f32.mrb[16].mxu1 }
0x1cbd   :  { %v1652_v20 = vadd.f32 %v1695_v19, %v1651_v52  ;;  %v1920_v59 = vpop.f32.mrb[17].mxu1 }
0x1cbf   :  { %1655 = vst [vmem:[%s2374_s4] sm:$0xff] %v1652_v20 }

</bundles_post_ra>
